<compile_context>
chip_gen: v7x
topology: tpu7x:2x2x1
jax: 0.10.0
libtpu: 0.0.40
codegen_flags: <defaults>
</compile_context>

<pallas_src>
import jax
import jax.numpy as jnp
from jax.experimental import pallas as pl
from jax.experimental.pallas import tpu as pltpu


def _make_chunked_copy_kernel(chunk_bounds):
    """Build a kernel that copies x -> o as len(chunk_bounds) concurrent DMAs.

    chunk_bounds: static list of (start, stop) Python ints along the leading
    dim. All DMAs are started before any is waited on, so up to K transfers
    are in flight at once (helps reach the v7x HBM roofline).
    """

    def kernel(x_hbm, o_hbm, sem):
        copies = []
        for i, (b0, b1) in enumerate(chunk_bounds):
            cp = pltpu.make_async_copy(
                x_hbm.at[b0:b1], o_hbm.at[b0:b1], sem.at[i]
            )
            cp.start()
            copies.append(cp)
        for cp in copies:
            cp.wait()

    return kernel


def _alias_noop_kernel(x_hbm, o_hbm):
    # Output aliases the input buffer; nothing to move. touch() pins the dep
    # so the aliased output is considered produced by this kernel.
    pltpu.touch(o_hbm)


def _pick_num_chunks(x, requested):
    """Choose how many concurrent DMA chunks to use (static, Python-side)."""
    if requested is not None:
        k = int(requested)
    else:
        # Only bother splitting for large copies (v7x issue-rate concern);
        # small tensors / v5e / v6e: a single bulk DMA is already at roofline.
        nbytes = x.size * x.dtype.itemsize
        k = 4 if nbytes >= (8 << 20) else 1
    if x.ndim == 0:
        return 1
    lead = x.shape[0]
    return max(1, min(k, lead))


def transformer_forward(x, *, materialize=True, donate=False, num_chunks=None):
    """Pallas implementation of Transformer.forward (identity).

    materialize=False : true optimum, zero HBM traffic (just returns x).
    donate=True       : aliased no-op kernel (zero HBM traffic, but the output
                        shares x's buffer — only use when donation is OK).
    otherwise         : grid-less bulk HBM->HBM DMA, optionally split into
                        `num_chunks` concurrent DMAs along the leading dim.
    """
    if not materialize:
        # Review item 1: the real hot-path optimum. No kernel, no traffic.
        return x

    nbytes = x.size * x.dtype.itemsize

    if donate:
        # Review item 2: aliased output, empty body -> zero HBM traffic.
        return pl.pallas_call(
            _alias_noop_kernel,
            out_shape=jax.ShapeDtypeStruct(x.shape, x.dtype),
            in_specs=[pl.BlockSpec(memory_space=pl.ANY)],
            out_specs=pl.BlockSpec(memory_space=pl.ANY),
            input_output_aliases={0: 0},
            cost_estimate=pl.CostEstimate(
                flops=0, transcendentals=0, bytes_accessed=0
            ),
        )(x)

    k = _pick_num_chunks(x, num_chunks)

    if k <= 1 or x.ndim == 0:
        # Single bulk DMA over the full refs.
        chunk_bounds = None

        def kernel(x_hbm, o_hbm, sem):
            cp = pltpu.make_async_copy(x_hbm, o_hbm, sem)
            cp.start()
            cp.wait()

        sem_shape = pltpu.SemaphoreType.DMA(())
    else:
        lead = x.shape[0]
        # Static, roughly-equal contiguous chunks along the leading dim.
        step = -(-lead // k)  # ceil
        chunk_bounds = []
        start = 0
        while start < lead:
            stop = min(start + step, lead)
            chunk_bounds.append((start, stop))
            start = stop
        kernel = _make_chunked_copy_kernel(chunk_bounds)
        sem_shape = pltpu.SemaphoreType.DMA((len(chunk_bounds),))

    return pl.pallas_call(
        kernel,
        out_shape=jax.ShapeDtypeStruct(x.shape, x.dtype),
        # Raw HBM refs: no auto-DMA through VMEM blocks, no grid pipelining.
        in_specs=[pl.BlockSpec(memory_space=pl.ANY)],
        out_specs=pl.BlockSpec(memory_space=pl.ANY),
        scratch_shapes=[sem_shape],
        cost_estimate=pl.CostEstimate(
            flops=0, transcendentals=0, bytes_accessed=2 * nbytes
        ),
    )(x)


# NOTE: __init__(num_encoders, num_heads, embed_dim, mlp_ratio) creates no
# parameters in the reference module, so there are no weights to initialize.
# TODO(synk): if the reference module ever gains real encoder blocks, add
# attention/MLP Pallas kernels here.


if __name__ == "__main__":
    key = jax.random.PRNGKey(0)
    B, S, D = 2, 8, 32  # small shapes consistent with a transformer input
    x = jax.random.normal(key, (B, S, D), dtype=jnp.float32)

    # 1) Single bulk DMA path.
    y = transformer_forward(x)
    jax.block_until_ready(y)
    assert y.shape == x.shape and y.dtype == x.dtype
    assert bool(jnp.array_equal(y, x))

    # 2) Multi-chunk concurrent-DMA path (the v7x-oriented form).
    y2 = transformer_forward(x, num_chunks=2)
    jax.block_until_ready(y2)
    assert bool(jnp.array_equal(y2, x))

    # 3) Zero-traffic pass-through path (the true hot-path optimum).
    y3 = transformer_forward(x, materialize=False)
    assert bool(jnp.array_equal(y3, x))

    print("KERNEL_OK")
</pallas_src>

<mosaic_0001>
module attributes {stable_mosaic.version = 11 : i64} {
  func.func @kernel(%arg0: memref<2x8x32xf32, #tpu.memory_space<any>>, %arg1: memref<2x8x32xf32, #tpu.memory_space<any>>, %arg2: memref<!tpu.dma_semaphore, #tpu.memory_space<semaphore_mem>>) attributes {dimension_semantics = [], scalar_prefetch = 0 : i64, scratch_operands = 1 : i64, tpu.core_type = #tpu.core_type<tc>} {
    tpu.enqueue_dma source(%arg0 : memref<2x8x32xf32, #tpu.memory_space<any>>) target(%arg1 : memref<2x8x32xf32, #tpu.memory_space<any>>) target_semaphore(%arg2 : memref<!tpu.dma_semaphore, #tpu.memory_space<semaphore_mem>>)
    tpu.wait_dma2 semaphore(%arg2 : memref<!tpu.dma_semaphore, #tpu.memory_space<semaphore_mem>>) src(%arg0 : memref<2x8x32xf32, #tpu.memory_space<any>>) dst(%arg1 : memref<2x8x32xf32, #tpu.memory_space<any>>)
    return
  }
}

</mosaic_0001>

<bundles_post_ra>
// kernel: tpu_custom_call.1
= control target key start
LH: loop header
LB: loop body
LE: loop exit
PB: predicated region body
PF: predicated region fallthrough
CT: control target
= control target key end

     0   :  { %s35_s6 = smov [#allocation2]   ;;  %s36_s7 = smov [#allocation3]   ;;  %s54_s0 = inlined_call_operand.hbm [shape: f32[2,8,32], index: 0, kind: input, shape index: {}]   ;;  %s55_s1 = inlined_call_operand.hbm [shape: f32[2,8,32], index: 1, kind: output, shape index: {}]  }
   0x1   :  { %s37_s8 = smov 0  }
   0x2   :  { %18 = dma.general %s54_s0, 256, %s55_s1, %s35_s6, %s36_s7, [#allocation4], %s37_s8, 0  }
   0x3   :  { %33 = dma.done.wait [#allocation2], 256 }
   0x4   :  { %34 = vsyncadd [#allocation2], 4294967040 }
   0x5   :  { %23 = vsyncmov [#allocation2] }
   0x8   :  { %s24_s13 = vpop.sfrf %23 }
   0x9   :  { %p29_p0 = scmp.ne.s32.totalorder %s24_s13, 0 }
   0xb   :  { %28 = shalt.err (%p29_p0)  }

</bundles_post_ra>
